<compile_context>
chip_gen: v7x
topology: tpu7x:2x2x1
jax: 0.10.0
libtpu: 0.0.40
codegen_flags: <defaults>
</compile_context>

<pallas_src>
import functools
import math

import jax
import jax.numpy as jnp
from jax import lax
from jax.experimental import pallas as pl
from jax.experimental.pallas import tpu as pltpu

_BN_EPS = 1e-5
_LANE = 128
_MAX_TP = 16384


# ----------------------------------------------------------------------------
# Tiling / VMEM helpers
# ----------------------------------------------------------------------------
def _round_up(x, m):
    return ((x + m - 1) // m) * m


@functools.lru_cache(maxsize=None)
def _tpu_vmem_capacity():
    try:
        return int(pltpu.get_tpu_info().vmem_capacity_bytes)
    except Exception:
        return 64 << 20          # conservative fallback (v7x-sized)


def _vmem_tile_budget():
    cap = _tpu_vmem_capacity()
    if cap <= (64 << 20):        # v7x: 64 MiB/TC -> leave room for compiler temps
        return 24 << 20
    return cap // 2              # v5e/v6e: 128 MiB -> ~64 MiB for streamed tiles


def _vmem_limit_cap():
    cap = _tpu_vmem_capacity()
    if cap <= (64 << 20):
        return 48 << 20          # never request the whole physical VMEM on v7x
    return 100 << 20             # v5e/v6e can go much higher


def _choose_tile_p(p, rows, itemsize):
    """Per-layer lane-tile size: power-of-2 multiple of 128, as large as the
    VMEM budget and the (rounded) problem size allow."""
    budget = _vmem_tile_budget()
    tp = _MAX_TP
    # bytes/lane ~ double-buffered streamed tiles (native dtype) + f32 temps.
    while tp > _LANE and tp * rows * (2 * itemsize + 4) > budget:
        tp //= 2
    p128 = _round_up(p, _LANE)
    while tp > _LANE and tp // 2 >= p128:
        tp //= 2
    return tp


def _vmem_limit_bytes(total_rows, c_acc, tp, itemsize):
    tiles = 2 * total_rows * tp * itemsize              # double-buffered streamed tiles
    temps = total_rows * tp * 4                         # f32 epilogue/compute temps
    resident = 8 * (total_rows * total_rows // 2        # weights (double-buffered, f32)
                    + 2 * total_rows
                    + c_acc * c_acc + c_acc)            # Gram + sum accumulators
    limit = tiles + temps + resident + (4 << 20)        # headroom
    return int(min(max(limit, 16 << 20), _vmem_limit_cap()))


# ----------------------------------------------------------------------------
# Kernels
# ----------------------------------------------------------------------------
def _stats_kernel(x_ref, s_ref, g_ref):
    # grid = (2, n_half): outer axis is "parallel" (v7x megacore split), inner
    # axis accumulates sum(x) and Gram(x)=x@x^T into this split's partial block.
    @pl.when(pl.program_id(1) == 0)
    def _init():
        s_ref[...] = jnp.zeros_like(s_ref)
        g_ref[...] = jnp.zeros_like(g_ref)

    x = x_ref[...]
    s_ref[...] += jnp.sum(x.astype(jnp.float32), axis=1, keepdims=True)
    g_ref[...] += lax.dot_general(x, x, (((1,), (1,)), ((), ())),
                                  preferred_element_type=jnp.float32)


def _apply_kernel(x_ref, w_ref, b_ref, o_ref, *, do_relu):
    # o = relu(W' x + b')  — BatchNorm already folded into (W', b') by wrapper.
    y = jnp.dot(w_ref[...], x_ref[...], preferred_element_type=jnp.float32)
    y = y + b_ref[...]
    if do_relu:
        y = jnp.maximum(y, 0.0)
    o_ref[...] = y.astype(o_ref.dtype)


def _apply_stats_kernel(x_ref, w_ref, b_ref, o_ref, s_ref, g_ref, *, do_relu):
    # Streaming pass that also accumulates sum/Gram of the *stored* output so the
    # next layer's BatchNorm can be folded without re-reading this layer's output.
    y = jnp.dot(w_ref[...], x_ref[...], preferred_element_type=jnp.float32)
    y = y + b_ref[...]
    if do_relu:
        y = jnp.maximum(y, 0.0)
    o = y.astype(o_ref.dtype)
    o_ref[...] = o

    @pl.when(pl.program_id(1) == 0)
    def _init():
        s_ref[...] = jnp.zeros_like(s_ref)
        g_ref[...] = jnp.zeros_like(g_ref)

    # Stats of the cast output: consistent with what the next layer reads, and
    # keeps the Gram matmul in the cheap native dtype (big win for bf16 on v5e).
    s_ref[...] += jnp.sum(o.astype(jnp.float32), axis=1, keepdims=True)
    g_ref[...] += lax.dot_general(o, o, (((1,), (1,)), ((), ())),
                                  preferred_element_type=jnp.float32)


def _fused_kernel(x_ref, w1_ref, b1_ref, w2_ref, b2_ref, o_ref, *, relu1, relu2):
    # Fused pair: layer L (BN folded into W1'/b1') followed by a BN-free layer
    # L+1; skips the intermediate activation HBM round trip.
    y = jnp.dot(w1_ref[...], x_ref[...], preferred_element_type=jnp.float32)
    y = y + b1_ref[...]
    if relu1:
        y = jnp.maximum(y, 0.0)
    y = y.astype(x_ref.dtype)        # match the unfused store/reload precision
    z = jnp.dot(w2_ref[...], y, preferred_element_type=jnp.float32)
    z = z + b2_ref[...]
    if relu2:
        z = jnp.maximum(z, 0.0)
    o_ref[...] = z.astype(o_ref.dtype)


# ----------------------------------------------------------------------------
# pallas_call wrappers
# ----------------------------------------------------------------------------
def _input_stats(x_cp, tp):
    c, p_pad = x_cp.shape
    n_tiles = p_pad // tp
    n_split = 2
    n_half = n_tiles // n_split
    return pl.pallas_call(
        _stats_kernel,
        out_shape=(jax.ShapeDtypeStruct((n_split, c, 1), jnp.float32),
                   jax.ShapeDtypeStruct((n_split, c, c), jnp.float32)),
        grid=(n_split, n_half),
        in_specs=[pl.BlockSpec((c, tp), lambda s, i: (0, s * n_half + i))],
        out_specs=(pl.BlockSpec((None, c, 1), lambda s, i: (s, 0, 0)),
                   pl.BlockSpec((None, c, c), lambda s, i: (s, 0, 0))),
        compiler_params=pltpu.CompilerParams(
            dimension_semantics=("parallel", "arbitrary"),
            vmem_limit_bytes=_vmem_limit_bytes(2 * c, c, tp, x_cp.dtype.itemsize)),
    )(x_cp)


def _apply_layer(x_cp, w, b, tp, do_relu, want_stats):
    c_in, p_pad = x_cp.shape
    c_out = w.shape[0]
    n_tiles = p_pad // tp
    vmem = _vmem_limit_bytes(c_in + c_out, c_out if want_stats else 0, tp,
                             x_cp.dtype.itemsize)

    if want_stats:
        n_split = 2
        n_half = n_tiles // n_split
        return pl.pallas_call(
            functools.partial(_apply_stats_kernel, do_relu=do_relu),
            out_shape=(jax.ShapeDtypeStruct((c_out, p_pad), x_cp.dtype),
                       jax.ShapeDtypeStruct((n_split, c_out, 1), jnp.float32),
                       jax.ShapeDtypeStruct((n_split, c_out, c_out), jnp.float32)),
            grid=(n_split, n_half),
            in_specs=[pl.BlockSpec((c_in, tp), lambda s, i: (0, s * n_half + i)),
                      pl.BlockSpec((c_out, c_in), lambda s, i: (0, 0)),
                      pl.BlockSpec((c_out, 1), lambda s, i: (0, 0))],
            out_specs=(pl.BlockSpec((c_out, tp), lambda s, i: (0, s * n_half + i)),
                       pl.BlockSpec((None, c_out, 1), lambda s, i: (s, 0, 0)),
                       pl.BlockSpec((None, c_out, c_out), lambda s, i: (s, 0, 0))),
            compiler_params=pltpu.CompilerParams(
                dimension_semantics=("parallel", "arbitrary"),
                vmem_limit_bytes=vmem),
        )(x_cp, w, b)

    return pl.pallas_call(
        functools.partial(_apply_kernel, do_relu=do_relu),
        out_shape=jax.ShapeDtypeStruct((c_out, p_pad), x_cp.dtype),
        grid=(n_tiles,),
        in_specs=[pl.BlockSpec((c_in, tp), lambda i: (0, i)),
                  pl.BlockSpec((c_out, c_in), lambda i: (0, 0)),
                  pl.BlockSpec((c_out, 1), lambda i: (0, 0))],
        out_specs=pl.BlockSpec((c_out, tp), lambda i: (0, i)),
        compiler_params=pltpu.CompilerParams(
            dimension_semantics=("parallel",),
            vmem_limit_bytes=vmem),
    )(x_cp, w, b)


def _apply_fused(x_cp, w1, b1, w2, b2, tp, relu1, relu2):
    c_in, p_pad = x_cp.shape
    c_mid = w1.shape[0]
    c_out = w2.shape[0]
    n_tiles = p_pad // tp
    vmem = _vmem_limit_bytes(c_in + c_mid + c_out, 0, tp, x_cp.dtype.itemsize)
    return pl.pallas_call(
        functools.partial(_fused_kernel, relu1=relu1, relu2=relu2),
        out_shape=jax.ShapeDtypeStruct((c_out, p_pad), x_cp.dtype),
        grid=(n_tiles,),
        in_specs=[pl.BlockSpec((c_in, tp), lambda i: (0, i)),
                  pl.BlockSpec((c_mid, c_in), lambda i: (0, 0)),
                  pl.BlockSpec((c_mid, 1), lambda i: (0, 0)),
                  pl.BlockSpec((c_out, c_mid), lambda i: (0, 0)),
                  pl.BlockSpec((c_out, 1), lambda i: (0, 0))],
        out_specs=pl.BlockSpec((c_out, tp), lambda i: (0, i)),
        compiler_params=pltpu.CompilerParams(
            dimension_semantics=("parallel",),
            vmem_limit_bytes=vmem),
    )(x_cp, w1, b1, w2, b2)


# ----------------------------------------------------------------------------
# BatchNorm fold + static plan + forward
# ----------------------------------------------------------------------------
def _fold_bn(w, b, gamma, beta, s_vec, g_mat, inv_p):
    # Fold training-mode BatchNorm (biased batch statistics over the true P) of
    # y = W x + b into an affine (W', b') using sum(x) and Gram(x) of the input.
    # TODO(synk): E[y^2]-E[y]^2 in f32 can cancel when |mean|>>std; acceptable for
    # post-ReLU/normalized activations, clamped at 0 for safety.
    m = s_vec * inv_p                         # (Cin,)  E[x]
    wm = w @ m                                # (Cout,)
    mean_y = wm + b                           # E[y]
    wg = w @ (g_mat * inv_p)                  # (Cout, Cin)
    e_y2 = jnp.sum(wg * w, axis=1) + 2.0 * wm * b + b * b      # E[y^2]
    var_y = jnp.maximum(e_y2 - mean_y * mean_y, 0.0)           # biased variance
    scale = gamma * lax.rsqrt(var_y + _BN_EPS)
    w_f = scale[:, None] * w
    b_f = scale * (b - mean_y) + beta
    return w_f, b_f


def _build_plan(channels, flags, p_true, itemsize, forced_tp=None):
    """Static execution plan: per-stage (layer index, fused?, tile_p, want_stats),
    the input-stats tile, and the padded P (multiple of 2*max_tile for the
    2-way-split stats grids)."""
    n_layers = len(flags)
    stages, tps = [], []
    li = 0
    while li < n_layers:
        c_in, c_out = channels[li], channels[li + 1]
        fuse = (li == n_layers - 2) and (not flags[li + 1][0])
        rows = c_in + c_out + (channels[li + 2] if fuse else 0)
        want_stats = (not fuse) and (li + 1 < n_layers) and flags[li + 1][0]
        tp = int(forced_tp) if forced_tp else _choose_tile_p(p_true, rows, itemsize)
        stages.append((li, bool(fuse), tp, bool(want_stats)))
        tps.append(tp)
        li += 2 if fuse else 1
    stats_tp = 0
    if flags[0][0]:
        stats_tp = int(forced_tp) if forced_tp else _choose_tile_p(
            p_true, 2 * channels[0], itemsize)
        tps.append(stats_tp)
    max_tp = max(tps)
    p_pad = _round_up(p_true, 2 * max_tp)
    return (int(p_pad), int(stats_tp), tuple(stages))


def _forward_impl(x, params, flags, plan):
    p_pad, stats_tp, stages = plan
    n, c0 = x.shape[0], x.shape[1]
    spatial = x.shape[2:]
    p_true = n * math.prod(spatial)
    x_cp = jnp.moveaxis(x, 1, 0).reshape(c0, -1)        # (C, P) channels-major
    n_pad = p_pad - p_true
    if n_pad:
        x_cp = jnp.pad(x_cp, ((0, 0), (0, n_pad)))
    dtype = x_cp.dtype
    inv_p = 1.0 / float(p_true)

    # Value held by the padded lanes of the current layer input (exact: padding
    # is zeros and each layer maps a constant column to a constant column).
    pad_col = jnp.zeros((c0,), jnp.float32)

    s = g = None
    if stats_tp:                               # first layer has BN -> stats of x
        s2, g2 = _input_stats(x_cp, stats_tp)
        s, g = jnp.sum(s2, axis=0), jnp.sum(g2, axis=0)

    for (li, fused, tp, want_stats) in stages:
        do_bn, do_relu = flags[li]
        w, b, gamma, beta = params[li]
        if do_bn:
            # Remove padded-lane contribution, then fold BN into W'/b'.
            s_c = s[:, 0] - n_pad * pad_col
            g_c = g - n_pad * jnp.outer(pad_col, pad_col)
            w_f, b_f = _fold_bn(w, b, gamma, beta, s_c, g_c, inv_p)
        else:
            w_f, b_f = w, b.astype(jnp.float32)

        w_d = w_f.astype(dtype)
        pad_lin = w_d.astype(jnp.float32) @ pad_col + b_f
        pad_next = jnp.maximum(pad_lin, 0.0) if do_relu else pad_lin
        pad_next = pad_next.astype(dtype).astype(jnp.float32)  # as stored

        if fused:
            _, relu2 = flags[li + 1]
            w2, b2, _, _ = params[li + 1]                       # no BN on layer li+1
            w2_d = w2.astype(dtype)
            pad_out = w2_d.astype(jnp.float32) @ pad_next + b2
            if relu2:
                pad_out = jnp.maximum(pad_out, 0.0)
            x_cp = _apply_fused(x_cp, w_d, b_f[:, None].astype(jnp.float32),
                                w2_d, b2[:, None].astype(jnp.float32),
                                tp, do_relu, relu2)
            s = g = None
            pad_col = pad_out.astype(dtype).astype(jnp.float32)
        else:
            res = _apply_layer(x_cp, w_d, b_f[:, None].astype(jnp.float32),
                               tp, do_relu, want_stats)
            if want_stats:
                x_cp, s2, g2 = res
                s, g = jnp.sum(s2, axis=0), jnp.sum(g2, axis=0)
            else:
                x_cp, s, g = res, None, None
            pad_col = pad_next

    c_last = x_cp.shape[0]
    out = x_cp[:, :p_true].reshape((c_last, n) + spatial)
    return jnp.moveaxis(out, 0, 1)             # back to (N, C, *spatial)


_forward_jit = jax.jit(_forward_impl, static_argnums=(2, 3))


# ----------------------------------------------------------------------------
# Module
# ----------------------------------------------------------------------------
class SharedMLP:
    """JAX/Pallas port of fpconv_code SharedMLP (1x1 conv + BatchNorm + ReLU stack).

    Matches a freshly-constructed PyTorch module in training mode: BatchNorm
    normalizes with biased batch statistics over (N, *spatial).
    """

    def __init__(self, in_channels, out_channels, dim=1, last_relu=True,
                 last_bn=True, key=None):
        if dim not in (1, 2):
            raise ValueError("dim must be 1 or 2")
        if not isinstance(out_channels, (list, tuple)):
            out_channels = [out_channels]
        self.dim = dim
        key = key if key is not None else jax.random.PRNGKey(0)
        params, flags = [], []
        ic = in_channels
        n_layers = len(out_channels)
        for i, oc in enumerate(out_channels):
            key, kw, kb = jax.random.split(key, 3)
            # PyTorch Conv default init: U(-1/sqrt(fan_in), 1/sqrt(fan_in)); k=1 => fan_in=ic
            bound = 1.0 / (float(ic) ** 0.5)
            w = jax.random.uniform(kw, (oc, ic), jnp.float32, -bound, bound)
            b = jax.random.uniform(kb, (oc,), jnp.float32, -bound, bound)
            last = i == n_layers - 1
            do_bn = True if not last else bool(last_bn)
            do_relu = True if not last else bool(last_relu)
            # PyTorch BatchNorm default init: gamma=1, beta=0.
            gamma = jnp.ones((oc,), jnp.float32)
            beta = jnp.zeros((oc,), jnp.float32)
            params.append((w, b, gamma, beta))
            flags.append((do_bn, do_relu))
            ic = oc
        self.params = tuple(params)
        self.flags = tuple(flags)
        self._channels = (int(in_channels),) + tuple(int(c) for c in out_channels)
        # TODO(synk): BatchNorm running_mean/var momentum updates are a training-time
        # buffer side effect that does not affect the forward output; not modeled here.

    def __call__(self, inputs):
        if isinstance(inputs, (list, tuple)):
            return (self._forward(inputs[0]), *inputs[1:])
        return self._forward(inputs)

    def _forward(self, x, tile_p=None):
        assert x.ndim == self.dim + 2
        p = x.shape[0] * math.prod(x.shape[2:])
        if tile_p is not None:
            assert tile_p % _LANE == 0
        plan = _build_plan(self._channels, self.flags, p,
                           jnp.dtype(x.dtype).itemsize, tile_p)
        return _forward_jit(x, self.params, self.flags, plan)


# ----------------------------------------------------------------------------
# Pure-JAX reference (two-pass BN, identical semantics) for correctness check.
# ----------------------------------------------------------------------------
def _reference(x, params, flags):
    n, c = x.shape[0], x.shape[1]
    spatial = x.shape[2:]
    xc = jnp.moveaxis(x, 1, 0).reshape(c, -1).astype(jnp.float32)
    for (w, b, gamma, beta), (do_bn, do_relu) in zip(params, flags):
        y = w @ xc + b[:, None]
        if do_bn:
            mean = y.mean(axis=1, keepdims=True)
            var = jnp.square(y - mean).mean(axis=1, keepdims=True)
            y = (y - mean) / jnp.sqrt(var + _BN_EPS)
            y = y * gamma[:, None] + beta[:, None]
        if do_relu:
            y = jnp.maximum(y, 0.0)
        xc = y
    oc = xc.shape[0]
    return jnp.moveaxis(xc.reshape((oc, n) + spatial), 0, 1)


if __name__ == "__main__":
    key = jax.random.PRNGKey(0)
    k_x, k_p, k_x1, k_p1 = jax.random.split(key, 4)

    # Conv2d path: NCHW (2, 4, 16, 16), SharedMLP(4, [32, 16], dim=2) -> (2, 16, 16, 16).
    # Exercises input-stats, streaming apply+stats (split grid) and the plain apply.
    x = jax.random.normal(k_x, (2, 4, 16, 16), jnp.float32)
    mlp = SharedMLP(4, [32, 16], dim=2, last_relu=True, last_bn=True, key=k_p)
    out = jax.block_until_ready(mlp(x))
    assert out.shape == (2, 16, 16, 16), out.shape
    ref = jax.block_until_ready(_reference(x, mlp.params, mlp.flags))
    assert jnp.allclose(out, ref, rtol=1e-2, atol=1e-2), (
        float(jnp.max(jnp.abs(out - ref))))

    # Same module, forced small tile: multi-tile streaming stats accumulation
    # (inner "arbitrary" axis length > 1) with the 2-way split grid.
    out_small = jax.block_until_ready(mlp._forward(x, tile_p=128))
    assert jnp.allclose(out_small, ref, rtol=1e-2, atol=1e-2), (
        float(jnp.max(jnp.abs(out_small - ref))))

    # Conv1d path with last_bn=False: exercises the fused (conv+BN+ReLU -> conv)
    # kernel, ragged P, padding and the padded-lane stats correction.
    x1 = jax.random.normal(k_x1, (2, 4, 200), jnp.float32)
    mlp1 = SharedMLP(4, [8, 16], dim=1, last_relu=False, last_bn=False, key=k_p1)
    out1 = jax.block_until_ready(mlp1(x1))
    assert out1.shape == (2, 16, 200), out1.shape
    ref1 = jax.block_until_ready(_reference(x1, mlp1.params, mlp1.flags))
    assert jnp.allclose(out1, ref1, rtol=1e-2, atol=1e-2), (
        float(jnp.max(jnp.abs(out1 - ref1))))

    # Tuple-input branch of forward().
    out_tup = mlp((x, jnp.arange(5)))
    jax.block_until_ready(out_tup[0])
    assert out_tup[0].shape == (2, 16, 16, 16) and out_tup[1].shape == (5,)

    print("KERNEL_OK")
</pallas_src>

<mosaic_0001>
module attributes {stable_mosaic.version = 11 : i64} {
  func.func @_stats_kernel(%arg0: i32, %arg1: i32, %arg2: memref<4x512xf32, #tpu.memory_space<vmem>>, %arg3: memref<1x4x1xf32, #tpu.memory_space<vmem>>, %arg4: memref<1x4x4xf32, #tpu.memory_space<vmem>>) attributes {dimension_semantics = [#tpu.dimension_semantics<parallel>, #tpu.dimension_semantics<arbitrary>], iteration_bounds = array<i64: 2, 1>, scalar_prefetch = 0 : i64, scratch_operands = 0 : i64, tpu.core_type = #tpu.core_type<tc>, window_params = [{transform_indices = @transform_0, window_bounds = array<i64: 4, 512>}, {transform_indices = @transform_1, window_bounds = array<i64: 1, 4, 1>}, {transform_indices = @transform_2, window_bounds = array<i64: 1, 4, 4>}]} {
    %c0_i32 = arith.constant 0 : i32
    %0 = arith.cmpi eq, %arg1, %c0_i32 : i32
    %1 = arith.extui %0 : i1 to i32
    %c0_i32_0 = arith.constant 0 : i32
    %2 = arith.cmpi ne, %1, %c0_i32_0 : i32
    scf.if %2 {
      %cst_15 = arith.constant 0.000000e+00 : f32
      %19 = vector.broadcast %cst_15 : f32 to vector<4x1xf32>
      %c0_16 = arith.constant 0 : index
      %c0_17 = arith.constant 0 : index
      %c0_18 = arith.constant 0 : index
      %20 = vector.load %arg3[%c0_16, %c0_17, %c0_18] : memref<1x4x1xf32, #tpu.memory_space<vmem>>, vector<1x4x1xf32>
      %21 = vector.shape_cast %20 : vector<1x4x1xf32> to vector<4x1xf32>
      %22 = vector.shape_cast %19 : vector<4x1xf32> to vector<1x4x1xf32>
      tpu.vector_store %arg3[%c0_16, %c0_17, %c0_18], %22 {strides = array<i32>} : memref<1x4x1xf32, #tpu.memory_space<vmem>>, vector<1x4x1xf32>,
      %cst_19 = arith.constant 0.000000e+00 : f32
      %23 = vector.broadcast %cst_19 : f32 to vector<4x4xf32>
      %c0_20 = arith.constant 0 : index
      %c0_21 = arith.constant 0 : index
      %c0_22 = arith.constant 0 : index
      %24 = vector.load %arg4[%c0_20, %c0_21, %c0_22] : memref<1x4x4xf32, #tpu.memory_space<vmem>>, vector<1x4x4xf32>
      %25 = vector.shape_cast %24 : vector<1x4x4xf32> to vector<4x4xf32>
      %26 = vector.shape_cast %23 : vector<4x4xf32> to vector<1x4x4xf32>
      tpu.vector_store %arg4[%c0_20, %c0_21, %c0_22], %26 {strides = array<i32>} : memref<1x4x4xf32, #tpu.memory_space<vmem>>, vector<1x4x4xf32>,
    } else {
    }
    %c0 = arith.constant 0 : index
    %c0_1 = arith.constant 0 : index
    %3 = vector.load %arg2[%c0, %c0_1] : memref<4x512xf32, #tpu.memory_space<vmem>>, vector<4x512xf32>
    %c0_2 = arith.constant 0 : index
    %c0_3 = arith.constant 0 : index
    %c0_4 = arith.constant 0 : index
    %4 = vector.load %arg3[%c0_2, %c0_3, %c0_4] : memref<1x4x1xf32, #tpu.memory_space<vmem>>, vector<1x4x1xf32>
    %5 = vector.shape_cast %4 : vector<1x4x1xf32> to vector<4x1xf32>
    %cst = arith.constant dense<0.000000e+00> : vector<4xf32>
    %6 = vector.multi_reduction <add>, %3, %cst [1] : vector<4x512xf32> to vector<4xf32>
    %7 = vector.shape_cast %6 : vector<4xf32> to vector<4x1xf32>
    %8 = arith.addf %5, %7 : vector<4x1xf32>
    %c0_5 = arith.constant 0 : index
    %c0_6 = arith.constant 0 : index
    %c0_7 = arith.constant 0 : index
    %9 = vector.load %arg3[%c0_5, %c0_6, %c0_7] : memref<1x4x1xf32, #tpu.memory_space<vmem>>, vector<1x4x1xf32>
    %10 = vector.shape_cast %9 : vector<1x4x1xf32> to vector<4x1xf32>
    %11 = vector.shape_cast %8 : vector<4x1xf32> to vector<1x4x1xf32>
    tpu.vector_store %arg3[%c0_5, %c0_6, %c0_7], %11 {strides = array<i32>} : memref<1x4x1xf32, #tpu.memory_space<vmem>>, vector<1x4x1xf32>,
    %c0_8 = arith.constant 0 : index
    %c0_9 = arith.constant 0 : index
    %c0_10 = arith.constant 0 : index
    %12 = vector.load %arg4[%c0_8, %c0_9, %c0_10] : memref<1x4x4xf32, #tpu.memory_space<vmem>>, vector<1x4x4xf32>
    %13 = vector.shape_cast %12 : vector<1x4x4xf32> to vector<4x4xf32>
    %cst_11 = arith.constant dense<0.000000e+00> : vector<4x4xf32>
    %14 = tpu.matmul %3, %3, %cst_11 {dimension_numbers = #tpu.dot_dimension_numbers<[1], [1], [0], [0], [0, 0, 1, 0], [], []>} : vector<4x512xf32>, vector<4x512xf32>, vector<4x4xf32> -> vector<4x4xf32>
    %15 = arith.addf %13, %14 : vector<4x4xf32>
    %c0_12 = arith.constant 0 : index
    %c0_13 = arith.constant 0 : index
    %c0_14 = arith.constant 0 : index
    %16 = vector.load %arg4[%c0_12, %c0_13, %c0_14] : memref<1x4x4xf32, #tpu.memory_space<vmem>>, vector<1x4x4xf32>
    %17 = vector.shape_cast %16 : vector<1x4x4xf32> to vector<4x4xf32>
    %18 = vector.shape_cast %15 : vector<4x4xf32> to vector<1x4x4xf32>
    tpu.vector_store %arg4[%c0_12, %c0_13, %c0_14], %18 {strides = array<i32>} : memref<1x4x4xf32, #tpu.memory_space<vmem>>, vector<1x4x4xf32>,
    return
  }
  func.func @transform_0(%arg0: i32, %arg1: i32) -> (i32, i32) {
    %c1_i32 = arith.constant 1 : i32
    %0 = arith.muli %arg0, %c1_i32 : i32
    %1 = arith.addi %0, %arg1 : i32
    %c0_i32 = arith.constant 0 : i32
    %c0_i32_0 = arith.constant 0 : i32
    return %c0_i32, %1 : i32, i32
  }
  func.func @transform_1(%arg0: i32, %arg1: i32) -> (i32, i32, i32) {
    %c0_i32 = arith.constant 0 : i32
    %c0_i32_0 = arith.constant 0 : i32
    %c0_i32_1 = arith.constant 0 : i32
    return %arg0, %c0_i32, %c0_i32_0 : i32, i32, i32
  }
  func.func @transform_2(%arg0: i32, %arg1: i32) -> (i32, i32, i32) {
    %c0_i32 = arith.constant 0 : i32
    %c0_i32_0 = arith.constant 0 : i32
    %c0_i32_1 = arith.constant 0 : i32
    return %arg0, %c0_i32, %c0_i32_0 : i32, i32, i32
  }
}

module attributes {stable_mosaic.version = 11 : i64} {
  func.func @_apply_stats_kernel(%arg0: i32, %arg1: i32, %arg2: memref<4x512xf32, #tpu.memory_space<vmem>>, %arg3: memref<32x4xf32, #tpu.memory_space<vmem>>, %arg4: memref<32x1xf32, #tpu.memory_space<vmem>>, %arg5: memref<32x512xf32, #tpu.memory_space<vmem>>, %arg6: memref<1x32x1xf32, #tpu.memory_space<vmem>>, %arg7: memref<1x32x32xf32, #tpu.memory_space<vmem>>) attributes {dimension_semantics = [#tpu.dimension_semantics<parallel>, #tpu.dimension_semantics<arbitrary>], iteration_bounds = array<i64: 2, 1>, scalar_prefetch = 0 : i64, scratch_operands = 0 : i64, tpu.core_type = #tpu.core_type<tc>, window_params = [{transform_indices = @transform_0, window_bounds = array<i64: 4, 512>}, {pipeline_mode = #tpu.pipeline_mode<synchronous>, transform_indices = @transform_1, window_bounds = array<i64: 32, 4>}, {pipeline_mode = #tpu.pipeline_mode<synchronous>, transform_indices = @transform_2, window_bounds = array<i64: 32, 1>}, {transform_indices = @transform_3, window_bounds = array<i64: 32, 512>}, {transform_indices = @transform_4, window_bounds = array<i64: 1, 32, 1>}, {transform_indices = @transform_5, window_bounds = array<i64: 1, 32, 32>}]} {
    %c0 = arith.constant 0 : index
    %c0_0 = arith.constant 0 : index
    %0 = vector.load %arg3[%c0, %c0_0] : memref<32x4xf32, #tpu.memory_space<vmem>>, vector<32x4xf32>
    %c0_1 = arith.constant 0 : index
    %c0_2 = arith.constant 0 : index
    %1 = vector.load %arg2[%c0_1, %c0_2] : memref<4x512xf32, #tpu.memory_space<vmem>>, vector<4x512xf32>
    %cst = arith.constant dense<0.000000e+00> : vector<32x512xf32>
    %2 = tpu.matmul %0, %1, %cst {dimension_numbers = #tpu.dot_dimension_numbers<[1], [0], [0], [1], [0, 0, 1, 1], [], []>} : vector<32x4xf32>, vector<4x512xf32>, vector<32x512xf32> -> vector<32x512xf32>
    %c0_3 = arith.constant 0 : index
    %c0_4 = arith.constant 0 : index
    %3 = vector.load %arg4[%c0_3, %c0_4] : memref<32x1xf32, #tpu.memory_space<vmem>>, vector<32x1xf32>
    %4 = vector.broadcast %3 : vector<32x1xf32> to vector<32x512xf32>
    %5 = arith.addf %2, %4 : vector<32x512xf32>
    %cst_5 = arith.constant 0.000000e+00 : f32
    %6 = vector.broadcast %cst_5 : f32 to vector<32x512xf32>
    %7 = arith.maximumf %5, %6 : vector<32x512xf32>
    %c0_6 = arith.constant 0 : index
    %c0_7 = arith.constant 0 : index
    %8 = vector.load %arg5[%c0_6, %c0_7] : memref<32x512xf32, #tpu.memory_space<vmem>>, vector<32x512xf32>
    tpu.vector_store %arg5[%c0_6, %c0_7], %7 {strides = array<i32>} : memref<32x512xf32, #tpu.memory_space<vmem>>, vector<32x512xf32>,
    %c0_i32 = arith.constant 0 : i32
    %9 = arith.cmpi eq, %arg1, %c0_i32 : i32
    %10 = arith.extui %9 : i1 to i32
    %c0_i32_8 = arith.constant 0 : i32
    %11 = arith.cmpi ne, %10, %c0_i32_8 : i32
    scf.if %11 {
      %cst_23 = arith.constant 0.000000e+00 : f32
      %27 = vector.broadcast %cst_23 : f32 to vector<32x1xf32>
      %c0_24 = arith.constant 0 : index
      %c0_25 = arith.constant 0 : index
      %c0_26 = arith.constant 0 : index
      %28 = vector.load %arg6[%c0_24, %c0_25, %c0_26] : memref<1x32x1xf32, #tpu.memory_space<vmem>>, vector<1x32x1xf32>
      %29 = vector.shape_cast %28 : vector<1x32x1xf32> to vector<32x1xf32>
      %30 = vector.shape_cast %27 : vector<32x1xf32> to vector<1x32x1xf32>
      tpu.vector_store %arg6[%c0_24, %c0_25, %c0_26], %30 {strides = array<i32>} : memref<1x32x1xf32, #tpu.memory_space<vmem>>, vector<1x32x1xf32>,
      %cst_27 = arith.constant 0.000000e+00 : f32
      %31 = vector.broadcast %cst_27 : f32 to vector<32x32xf32>
      %c0_28 = arith.constant 0 : index
      %c0_29 = arith.constant 0 : index
      %c0_30 = arith.constant 0 : index
      %32 = vector.load %arg7[%c0_28, %c0_29, %c0_30] : memref<1x32x32xf32, #tpu.memory_space<vmem>>, vector<1x32x32xf32>
      %33 = vector.shape_cast %32 : vector<1x32x32xf32> to vector<32x32xf32>
      %34 = vector.shape_cast %31 : vector<32x32xf32> to vector<1x32x32xf32>
      tpu.vector_store %arg7[%c0_28, %c0_29, %c0_30], %34 {strides = array<i32>} : memref<1x32x32xf32, #tpu.memory_space<vmem>>, vector<1x32x32xf32>,
    } else {
    }
    %c0_9 = arith.constant 0 : index
    %c0_10 = arith.constant 0 : index
    %c0_11 = arith.constant 0 : index
    %12 = vector.load %arg6[%c0_9, %c0_10, %c0_11] : memref<1x32x1xf32, #tpu.memory_space<vmem>>, vector<1x32x1xf32>
    %13 = vector.shape_cast %12 : vector<1x32x1xf32> to vector<32x1xf32>
    %cst_12 = arith.constant dense<0.000000e+00> : vector<32xf32>
    %14 = vector.multi_reduction <add>, %7, %cst_12 [1] : vector<32x512xf32> to vector<32xf32>
    %15 = vector.shape_cast %14 : vector<32xf32> to vector<32x1xf32>
    %16 = arith.addf %13, %15 : vector<32x1xf32>
    %c0_13 = arith.constant 0 : index
    %c0_14 = arith.constant 0 : index
    %c0_15 = arith.constant 0 : index
    %17 = vector.load %arg6[%c0_13, %c0_14, %c0_15] : memref<1x32x1xf32, #tpu.memory_space<vmem>>, vector<1x32x1xf32>
    %18 = vector.shape_cast %17 : vector<1x32x1xf32> to vector<32x1xf32>
    %19 = vector.shape_cast %16 : vector<32x1xf32> to vector<1x32x1xf32>
    tpu.vector_store %arg6[%c0_13, %c0_14, %c0_15], %19 {strides = array<i32>} : memref<1x32x1xf32, #tpu.memory_space<vmem>>, vector<1x32x1xf32>,
    %c0_16 = arith.constant 0 : index
    %c0_17 = arith.constant 0 : index
    %c0_18 = arith.constant 0 : index
    %20 = vector.load %arg7[%c0_16, %c0_17, %c0_18] : memref<1x32x32xf32, #tpu.memory_space<vmem>>, vector<1x32x32xf32>
    %21 = vector.shape_cast %20 : vector<1x32x32xf32> to vector<32x32xf32>
    %cst_19 = arith.constant dense<0.000000e+00> : vector<32x32xf32>
    %22 = tpu.matmul %7, %7, %cst_19 {dimension_numbers = #tpu.dot_dimension_numbers<[1], [1], [0], [0], [0, 0, 1, 0], [], []>} : vector<32x512xf32>, vector<32x512xf32>, vector<32x32xf32> -> vector<32x32xf32>
    %23 = arith.addf %21, %22 : vector<32x32xf32>
    %c0_20 = arith.constant 0 : index
    %c0_21 = arith.constant 0 : index
    %c0_22 = arith.constant 0 : index
    %24 = vector.load %arg7[%c0_20, %c0_21, %c0_22] : memref<1x32x32xf32, #tpu.memory_space<vmem>>, vector<1x32x32xf32>
    %25 = vector.shape_cast %24 : vector<1x32x32xf32> to vector<32x32xf32>
    %26 = vector.shape_cast %23 : vector<32x32xf32> to vector<1x32x32xf32>
    tpu.vector_store %arg7[%c0_20, %c0_21, %c0_22], %26 {strides = array<i32>} : memref<1x32x32xf32, #tpu.memory_space<vmem>>, vector<1x32x32xf32>,
    return
  }
  func.func @transform_0(%arg0: i32, %arg1: i32) -> (i32, i32) {
    %c1_i32 = arith.constant 1 : i32
    %0 = arith.muli %arg0, %c1_i32 : i32
    %1 = arith.addi %0, %arg1 : i32
    %c0_i32 = arith.constant 0 : i32
    %c0_i32_0 = arith.constant 0 : i32
    return %c0_i32, %1 : i32, i32
  }
  func.func @transform_1(%arg0: i32, %arg1: i32) -> (i32, i32) {
    %c0_i32 = arith.constant 0 : i32
    %c0_i32_0 = arith.constant 0 : i32
    %c0_i32_1 = arith.constant 0 : i32
    return %c0_i32, %c0_i32_0 : i32, i32
  }
  func.func @transform_2(%arg0: i32, %arg1: i32) -> (i32, i32) {
    %c0_i32 = arith.constant 0 : i32
    %c0_i32_0 = arith.constant 0 : i32
    %c0_i32_1 = arith.constant 0 : i32
    return %c0_i32, %c0_i32_0 : i32, i32
  }
  func.func @transform_3(%arg0: i32, %arg1: i32) -> (i32, i32) {
    %c1_i32 = arith.constant 1 : i32
    %0 = arith.muli %arg0, %c1_i32 : i32
    %1 = arith.addi %0, %arg1 : i32
    %c0_i32 = arith.constant 0 : i32
    %c0_i32_0 = arith.constant 0 : i32
    return %c0_i32, %1 : i32, i32
  }
  func.func @transform_4(%arg0: i32, %arg1: i32) -> (i32, i32, i32) {
    %c0_i32 = arith.constant 0 : i32
    %c0_i32_0 = arith.constant 0 : i32
    %c0_i32_1 = arith.constant 0 : i32
    return %arg0, %c0_i32, %c0_i32_0 : i32, i32, i32
  }
  func.func @transform_5(%arg0: i32, %arg1: i32) -> (i32, i32, i32) {
    %c0_i32 = arith.constant 0 : i32
    %c0_i32_0 = arith.constant 0 : i32
    %c0_i32_1 = arith.constant 0 : i32
    return %arg0, %c0_i32, %c0_i32_0 : i32, i32, i32
  }
}

module attributes {stable_mosaic.version = 11 : i64} {
  func.func @_apply_kernel(%arg0: i32, %arg1: memref<32x512xf32, #tpu.memory_space<vmem>>, %arg2: memref<16x32xf32, #tpu.memory_space<vmem>>, %arg3: memref<16x1xf32, #tpu.memory_space<vmem>>, %arg4: memref<16x512xf32, #tpu.memory_space<vmem>>) attributes {dimension_semantics = [#tpu.dimension_semantics<parallel>], iteration_bounds = array<i64: 2>, scalar_prefetch = 0 : i64, scratch_operands = 0 : i64, tpu.core_type = #tpu.core_type<tc>, window_params = [{transform_indices = @transform_0, window_bounds = array<i64: 32, 512>}, {pipeline_mode = #tpu.pipeline_mode<synchronous>, transform_indices = @transform_1, window_bounds = array<i64: 16, 32>}, {pipeline_mode = #tpu.pipeline_mode<synchronous>, transform_indices = @transform_2, window_bounds = array<i64: 16, 1>}, {transform_indices = @transform_3, window_bounds = array<i64: 16, 512>}]} {
    %c0 = arith.constant 0 : index
    %c0_0 = arith.constant 0 : index
    %0 = vector.load %arg2[%c0, %c0_0] : memref<16x32xf32, #tpu.memory_space<vmem>>, vector<16x32xf32>
    %c0_1 = arith.constant 0 : index
    %c0_2 = arith.constant 0 : index
    %1 = vector.load %arg1[%c0_1, %c0_2] : memref<32x512xf32, #tpu.memory_space<vmem>>, vector<32x512xf32>
    %cst = arith.constant dense<0.000000e+00> : vector<16x512xf32>
    %2 = tpu.matmul %0, %1, %cst {dimension_numbers = #tpu.dot_dimension_numbers<[1], [0], [0], [1], [0, 0, 1, 1], [], []>} : vector<16x32xf32>, vector<32x512xf32>, vector<16x512xf32> -> vector<16x512xf32>
    %c0_3 = arith.constant 0 : index
    %c0_4 = arith.constant 0 : index
    %3 = vector.load %arg3[%c0_3, %c0_4] : memref<16x1xf32, #tpu.memory_space<vmem>>, vector<16x1xf32>
    %4 = vector.broadcast %3 : vector<16x1xf32> to vector<16x512xf32>
    %5 = arith.addf %2, %4 : vector<16x512xf32>
    %cst_5 = arith.constant 0.000000e+00 : f32
    %6 = vector.broadcast %cst_5 : f32 to vector<16x512xf32>
    %7 = arith.maximumf %5, %6 : vector<16x512xf32>
    %c0_6 = arith.constant 0 : index
    %c0_7 = arith.constant 0 : index
    %8 = vector.load %arg4[%c0_6, %c0_7] : memref<16x512xf32, #tpu.memory_space<vmem>>, vector<16x512xf32>
    tpu.vector_store %arg4[%c0_6, %c0_7], %7 {strides = array<i32>} : memref<16x512xf32, #tpu.memory_space<vmem>>, vector<16x512xf32>,
    return
  }
  func.func @transform_0(%arg0: i32) -> (i32, i32) {
    %c0_i32 = arith.constant 0 : i32
    %c0_i32_0 = arith.constant 0 : i32
    return %c0_i32, %arg0 : i32, i32
  }
  func.func @transform_1(%arg0: i32) -> (i32, i32) {
    %c0_i32 = arith.constant 0 : i32
    %c0_i32_0 = arith.constant 0 : i32
    %c0_i32_1 = arith.constant 0 : i32
    return %c0_i32, %c0_i32_0 : i32, i32
  }
  func.func @transform_2(%arg0: i32) -> (i32, i32) {
    %c0_i32 = arith.constant 0 : i32
    %c0_i32_0 = arith.constant 0 : i32
    %c0_i32_1 = arith.constant 0 : i32
    return %c0_i32, %c0_i32_0 : i32, i32
  }
  func.func @transform_3(%arg0: i32) -> (i32, i32) {
    %c0_i32 = arith.constant 0 : i32
    %c0_i32_0 = arith.constant 0 : i32
    return %c0_i32, %arg0 : i32, i32
  }
}

</mosaic_0001>

<bundles_post_ra>
// kernel: _forward_impl.3
= control target key start
LH: loop header
LB: loop body
LE: loop exit
PB: predicated region body
PF: predicated region fallthrough
CT: control target
= control target key end

     0   :  { %s518_s9 = smov 0   ;;  %s520_s10 = smov 0   ;;  %s565_s0 = inlined_call_operand.vmem [shape: f32[4,1024], index: 0, kind: input, shape index: {}]   ;;  %s566_s1 = inlined_call_operand.vmem [shape: f32[2,4,1], index: 1, kind: output, shape index: {0}]   ;;  %s567_s2 = inlined_call_operand.vmem [shape: f32[2,4,4], index: 2, kind: output, shape index: {1}]  }
   0x1   :  { %s522_s11 = smov 0  }
   0x2 LB: > { %s25_s12 = sadd.s32 1, %s496_s10  ;;  %p444_p0 = scmp.ge.s32.totalorder %s500_s11, 1  ;;  %s500_s11 = sphi %s522_s11, %s13_s11   ;;  %s496_s10 = sphi %s520_s10, %s569_s10   ;;  %s492_s9 = sphi %s518_s9, %s568_s9  }
   0x3   : > { %p27_p1 = scmp.ge.s32.totalorder %s25_s12, 2  ;;  %p132_p2 = scmp.lt.s32.totalorder %s500_s11, 3 }
   0x5   : > { %s571_s12 = smov (%p27_p1, %s25_s12), 0  ;;  %p133_p3 = pnand %p444_p0, %p132_p2 }
   0x6   : > { %s445_s13 = sshll.u32 (!%p133_p3), %s492_s9, 2  ;;  %vm191_vm0 = vcmask (!%p133_p3), 1043456   ;;  %p166_p5 = scmp.lt.s32.totalorder (!%p133_p3), %s492_s9, 1  ;;  %vm180_vm1 = vcmask (!%p133_p3), 27648   ;;  %vm178_vm2 = vcmask (!%p133_p3), 3072   ;;  %v502_v11 = vmov (!%p133_p3), 0.0  }
   0x7   : > { %136 = sbr.rel (%p133_p3) target bundleno = 241 (0xf1), region = 24  ;;  %p160_p4 = scmp.lt.s32.totalorder (!%p133_p3), %s445_s13, 7 }
   0xe   : > { %s573_s13 = smov (!%p160_p4, %s445_s13), 7  ;;  %s575_s9 = smov (!%p166_p5, %s492_s9), 1 }
   0xf   : > { %s446_s14 = sshll.u32 %s573_s13, 2  ;;  %s447_s18 = sshll.u32 %s575_s9, 2 }
  0x10   : > { %s163_s17 = scalar_lea.vmem %s565_s0, %s446_s14  ;;  %s173_s21 = scalar_lea.vmem %s567_s2, %s447_s18 }
  0x11   : > { %v182_v0 = vld [vmem:[%s163_s17] sm:$0xff]  ;;  %v183_v1 = vld [vmem:[%s163_s17 + $0x8] sm:$0xff]  ;;  %s169_s24 = scalar_lea.vmem %s566_s1, %s447_s18  ;;  %181 = vst.msk [vmem:[%s173_s21] sm:$0xf] %vm180_vm1, %v502_v11 }
  0x12   : > { %v187_v2 = vcombine.high %v182_v0, %v182_v0  ;;  %v188_v3 = vcombine.high %v183_v1, %v183_v1  ;;  %v192_v4 = vsel %vm191_vm0, %v182_v0, 0.0  ;;  %v195_v6 = vsel %vm191_vm0, %v183_v1, 0.0  ;;  %179 = vst.msk [vmem:[%s169_s24] sm:$0xf] %vm178_vm2, %v502_v11 }
  0x14   : > { %205 = vmatprep.subr.mxu0 %v187_v2  ;;  %275 = vmatprep.subr.mxu1 %v188_v3  ;;  %v193_v5 = vsel %vm191_vm0, %v187_v2, 0.0  ;;  %v197_v8 = vsel %vm191_vm0, %v188_v3, 0.0 }
  0x15   : > { %206 = vmatpush1.xpose.msra.mxu0 %v182_v0  ;;  %276 = vmatpush1.xpose.msra.mxu1 %v183_v1  ;;  %v194_v7 = vadd.f32 %v193_v5, %v192_v4 }
  0x16   : > { %269 = vmatprep.mubr.f32.mxu0 %v187_v2  ;;  %339 = vmatprep.mubr.f32.mxu1 %v188_v3 }
  0x17   : > { %v196_v9 = vadd.f32 %v195_v6, %v194_v7 }
  0x18   : > { %270 = vmatmul.mubr.f32.vlgmr.msra.gmra.mrb[0].mxu0 %v182_v0  ;;  %340 = vmatmul.mubr.f32.vlgmr.msra.gmra.mrb[0].mxu1 %v183_v1  ;;  %v204_v16 = vld [vmem:[%s173_s21] sm:$0xf] }
  0x19   : > { %v198_v10 = vadd.f32 %v197_v8, %v196_v9  ;;  %v184_v12 = vld [vmem:[%s169_s24] sm:$0xf] }
  0x1b   : > { %199 = vadd.xlane.f32.xlu0 %v198_v10 }
  0xa8   : > { %v200_v13 = vpop.xlane.xlu0 %199 }
  0xa9   : > { %v201_v14 = vadd.f32 %v200_v13, %v184_v12 }
  0xab   : > { %203 = vst.msk [vmem:[%s169_s24] sm:$0xf] %vm178_vm2, %v201_v14 }
  0xeb   : > { %v271_v15 = vpop.f32.mrb[0].mxu0  ;;  %v341_v17 = vpop.f32.mrb[0].mxu1 }
  0xec   : > { %v342_v18 = vadd.f32 %v341_v17, %v271_v15  ;;  %v273_v19 = vpop.f32.mrb[1].mxu0  ;;  %v343_v20 = vpop.f32.mrb[1].mxu1 }
  0xee   : > { %v345_v21 = vadd.f32 %v342_v18, %v204_v16 }
  0xf0   : > { %347 = vst.msk [vmem:[%s173_s21] sm:$0xf] %vm180_vm1, %v345_v21 }
  0xf1 PF: > { %s13_s11 = sadd.s32 1, %s500_s11   ;;  %s568_s9 = smov %s496_s10 }
  0xf2   : > { %p10_p6 = scmp.ge.s32.totalorder %s13_s11, 4   ;;  %s569_s10 = smov %s571_s12 }
  0xf4   :  { %12 = sbr.rel (!%p10_p6) target bundleno = 2 (0x2), region = 70 }

// kernel: _forward_impl.4
= control target key start
LH: loop header
LB: loop body
LE: loop exit
PB: predicated region body
PF: predicated region fallthrough
CT: control target
= control target key end

     0   :  { %s1115_s18 = smov 0   ;;  %s1117_s19 = smov 0   ;;  %s1361_s0 = inlined_call_operand.vmem [shape: f32[4,1024], index: 0, kind: input, shape index: {}]   ;;  %s1362_s1 = inlined_call_operand.vmem [shape: f32[32,4], index: 1, kind: input, shape index: {}]   ;;  %s1363_s2 = inlined_call_operand.vmem [shape: f32[32,1], index: 2, kind: input, shape index: {}]   ;;  %s1364_s3 = inlined_call_operand.vmem [shape: f32[32,1024], index: 3, kind: output, shape index: {0}]   ;;  %s1365_s4 = inlined_call_operand.vmem [shape: f32[2,32,1], index: 4, kind: output, shape index: {1}]   ;;  %s1366_s5 = inlined_call_operand.vmem [shape: f32[2,32,32], index: 5, kind: output, shape index: {2}]  }
   0x1   :  { %s1119_s20 = smov 0   ;;  %s1121_s21 = smov 0  }
   0x2   :  { %s1123_s22 = smov 0  }
   0x3 LB: > { %s949_s23 = sadd.s32 4294967295, %s1081_s22   ;;  %s28_s24 = sadd.s32 1, %s1077_s21  ;;  %s1081_s22 = sphi %s1123_s22, %s16_s22   ;;  %s1077_s21 = sphi %s1121_s21, %s1371_s21   ;;  %s1073_s20 = sphi %s1119_s20, %s1370_s20   ;;  %s1069_s19 = sphi %s1117_s19, %s1369_s19   ;;  %s1065_s18 = sphi %s1115_s18, %s1368_s18  }
   0x4   : > { %p30_p0 = scmp.ge.s32.totalorder %s28_s24, 2  ;;  %s107_s25 = sadd.s32 1, %s1069_s19 }
   0x5   : > { %p117_p1 = scmp.ne.s32.totalorder %s1069_s19, %s1065_s18  ;;  %p118_p2 = scmp.eq.s32.totalorder %s949_s23, 1 }
   0x6   : > { %s1373_s24 = smov (%p30_p0, %s28_s24), 0  ;;  %p953_p4 = scmp.ge.s32.totalorder %s1081_s22, 1 }
   0x7   : > { %p1147_p3 = por %p118_p2, %p117_p1  ;;  %s104_s27 = ssub.s32 %s1077_s21, %s1373_s24 }
   0x8   : > { %p211_p5 = scmp.lt.s32.totalorder %s1081_s22, 3  ;;  %p105_p6 = scmp.eq.s32.totalorder %s104_s27, 0 }
   0xa   : > { %p212_p7 = pnand %p953_p4, %p211_p5 }
   0xb   : > { %s1156_s28 = scalar_select %p105_p6, %s1069_s19, %s107_s25  }
   0xc   : > { %215 = sbr.rel (%p212_p7) target bundleno = 497 (0x1f1), region = 32  ;;  %s955_s29 = sshll.u32 (!%p212_p7), %s1073_s20, 2  ;;  %v1083_v0 = vmov (!%p212_p7), 0.0   ;;  %v275_v1 = vld [vmem:[%s1363_s2] sm:$0xff] (!%p212_p7)  ;;  %v1084_v2 = vmov (!%p212_p7), 0   ;;  %v277_v3 = vld [vmem:[%s1363_s2 + $0x10] sm:$0xff] (!%p212_p7) }
   0xd   : > { %p251_p8 = scmp.lt.s32.totalorder (!%p212_p7), %s955_s29, 7  ;;  %389 = vmatprep.mubr.f32.mxu0 (!%p212_p7), %v1083_v0  ;;  %478 = vmatprep.mubr.f32.mxu1 (!%p212_p7), %v1083_v0  ;;  %v276_v4 = vld [vmem:[%s1363_s2 + $0x8] sm:$0xff] (!%p212_p7)  ;;  %v278_v5 = vld [vmem:[%s1363_s2 + $0x18] sm:$0xff] (!%p212_p7)  ;;  %vm316_vm0 = vcmask (!%p212_p7), 1043456   ;;  %v269_v10 = vld [vmem:[%s1362_s1] sm:$0xff] (!%p212_p7)  ;;  %vm303_vm1 = vcmask (!%p212_p7), 31744  }
   0xe   : > { %1039 = vset.pattern.permute.xlu0 (!%p212_p7), %v1084_v2  ;;  %1040 = vset.pattern.permute.xlu1 (!%p212_p7), %v1084_v2  ;;  %v270_v11 = vld [vmem:[%s1362_s1 + $0x8] sm:$0xff] (!%p212_p7)  ;;  %v271_v12 = vld [vmem:[%s1362_s1 + $0x10] sm:$0xff] (!%p212_p7)  ;;  %v272_v13 = vld [vmem:[%s1362_s1 + $0x18] sm:$0xff] (!%p212_p7)  ;;  %p259_p9 = scmp.lt.s32.totalorder (!%p212_p7), %s1073_s20, 1  ;;  %vm539_vm2 = vcmask (!%p212_p7), 7168   ;;  %vm544_vm3 = vcmask (!%p212_p7), 261120  }
   0xf   : > { %281 = vperm.xlu0 (!%p212_p7), %1039, %v275_v1   ;;  %291 = vperm.xlu1 (!%p212_p7), %1040, %v277_v3  }
  0x13   : > { %s1375_s29 = smov (!%p251_p8, %s955_s29), 7  ;;  %286 = vperm.xlu0 %1039, %v276_v4   ;;  %296 = vperm.xlu1 %1040, %v278_v5   ;;  %s980_s23 = sshll.u32 (%p1147_p3), %s1073_s20, 5 }
  0x14   : > { %s956_s13 = sshll.u32 %s1375_s29, 2  ;;  %s785_s29 = scalar_lea.vmem (%p1147_p3), %s1364_s3, %s980_s23 }
  0x15   : > { %s254_s16 = scalar_lea.vmem %s1361_s0, %s956_s13  ;;  %s232_s13 = sand.u32 1, %s1065_s18  }
  0x16   : > { %v273_v6 = vld [vmem:[%s254_s16] sm:$0xff]  ;;  %v274_v7 = vld [vmem:[%s254_s16 + $0x8] sm:$0xff]  ;;  %s1204_s8 = scalar_select %p259_p9, %s1073_s20, 1 }
  0x17   : > { %v301_v8 = vcombine.high %v273_v6, %v273_v6  ;;  %v302_v9 = vcombine.high %v274_v7, %v274_v7  ;;  %s954_s14 = sshll.u32 %s232_s13, 7 }
  0x18   : > { %s978_s9 = sshll.u32 %s1204_s8, 5  ;;  %s1231_s18 = scalar_lea.vmem [#allocation2], %s954_s14 }
  0x19   : > { %961 = vmatprep.subr.msk.mxu0 %vm316_vm0, %v301_v8  ;;  %967 = vmatprep.subr.msk.mxu1 %vm316_vm0, %v302_v9  ;;  %s1212_s12 = scalar_lea.vmem %s1365_s4, %s978_s9  ;;  %s1286_s17 = scalar_lea.vmem %s1366_s5, %s978_s9 }
  0x1a   : > { %962 = vmatpush1.msk.msra.mxu0 %vm316_vm0, %v273_v6  ;;  %968 = vmatpush1.msk.msra.mxu1 %vm316_vm0, %v274_v7  ;;  %540 = vst.msk [vmem:[%s1212_s12] sm:$0xff] %vm539_vm2, %v1083_v0  ;;  %541 = vst.msk [vmem:[%s1212_s12 + $0x8] sm:$0xff] %vm539_vm2, %v1083_v0 }
  0x1b   : > { %963 = vmatmul.mubr.msk.f32.vlgmr.msra.gmra.mrb[0].mxu0 %vm303_vm1, %v269_v10  ;;  %969 = vmatmul.mubr.msk.f32.vlgmr.msra.gmra.mrb[0].mxu1 %vm303_vm1, %v269_v10  ;;  %542 = vst.msk [vmem:[%s1212_s12 + $0x10] sm:$0xff] %vm539_vm2, %v1083_v0  ;;  %543 = vst.msk [vmem:[%s1212_s12 + $0x18] sm:$0xff] %vm539_vm2, %v1083_v0 }
  0x1c   : > { %395 = vmatprep.mubr.f32.mxu0 %v1083_v0  ;;  %484 = vmatprep.mubr.f32.mxu1 %v1083_v0  ;;  %545 = vst.msk [vmem:[%s1286_s17] sm:$0xff] %vm544_vm3, %v1083_v0  ;;  %546 = vst.msk [vmem:[%s1286_s17 + $0x8] sm:$0xff] %vm544_vm3, %v1083_v0 }
  0x1d   : > { %547 = vst.msk [vmem:[%s1286_s17 + $0x10] sm:$0xff] %vm544_vm3, %v1083_v0  ;;  %548 = vst.msk [vmem:[%s1286_s17 + $0x18] sm:$0xff] %vm544_vm3, %v1083_v0 }
  0x1f   : > { %964 = vmatmul.mubr.msk.f32.gmra.mrb[2].mxu0 %vm303_vm1, %v270_v11  ;;  %970 = vmatmul.mubr.msk.f32.gmra.mrb[2].mxu1 %vm303_vm1, %v270_v11 }
  0x20   : > { %401 = vmatprep.mubr.f32.mxu0 %v1083_v0  ;;  %490 = vmatprep.mubr.f32.mxu1 %v1083_v0 }
  0x23   : > { %965 = vmatmul.mubr.msk.f32.gmra.mrb[4].mxu0 %vm303_vm1, %v271_v12  ;;  %971 = vmatmul.mubr.msk.f32.gmra.mrb[4].mxu1 %vm303_vm1, %v271_v12 }
  0x24   : > { %407 = vmatprep.mubr.f32.mxu0 %v1083_v0  ;;  %496 = vmatprep.mubr.f32.mxu1 %v1083_v0 }
  0x27   : > { %966 = vmatmul.mubr.msk.f32.gmra.mrb[6].mxu0 %vm303_vm1, %v272_v13  ;;  %972 = vmatmul.mubr.msk.f32.gmra.mrb[6].mxu1 %vm303_vm1, %v272_v13 }
  0x8e   : > { %v282_v14 = vpop.permute.xlu0 %281  ;;  %v292_v26 = vpop.permute.xlu1 %291 }
  0x92   : > { %v287_v25 = vpop.permute.xlu0 %286  ;;  %v297_v57 = vpop.permute.xlu1 %296 }
  0xee   : > { %v391_v15 = vpop.f32.mrb[0].mxu0  ;;  %v480_v16 = vpop.f32.mrb[0].mxu1 }
  0xef   : > { %v392_v17 = vadd.f32 %v391_v15, %v282_v14  ;;  %v481_v18 = vadd.f32 %v480_v16, %v282_v14  ;;  %v393_v19 = vpop.f32.mrb[1].mxu0  ;;  %v482_v20 = vpop.f32.mrb[1].mxu1 }
  0xf0   : > { %v394_v21 = vadd.f32 %v393_v19, %v282_v14  ;;  %v483_v22 = vadd.f32 %v482_v20, %v282_v14 }
  0xf1   : > { %v1227_v23 = vmax.f32 %v392_v17, 0.0  ;;  %v1229_v24 = vmax.f32 %v481_v18, 0.0 }
  0xf2   : > { %v504_v27 = vmax.f32 %v394_v21, 0.0  ;;  %v506_v28 = vmax.f32 %v483_v22, 0.0  ;;  %v397_v29 = vpop.f32.mrb[2].mxu0  ;;  %v486_v30 = vpop.f32.mrb[2].mxu1 }
  0xf3   : > { %519 = vst [vmem:[%s1231_s18] sm:$0xff] %v1227_v23  ;;  %521 = vst [vmem:[%s1231_s18 + $0x10] sm:$0xff] %v1229_v24  ;;  %v398_v31 = vadd.f32 %v397_v29, %v287_v25  ;;  %v487_v32 = vadd.f32 %v486_v30, %v287_v25  ;;  %v399_v33 = vpop.f32.mrb[3].mxu0  ;;  %v488_v34 = vpop.f32.mrb[3].mxu1  ;;  %v551_v29 = vld [vmem:[%s1212_s12 + $0x10] sm:$0xff] }
  0xf4   : > { %520 = vst [vmem:[%s1231_s18 + $0x8] sm:$0xff] %v504_v27  ;;  %522 = vst [vmem:[%s1231_s18 + $0x18] sm:$0xff] %v506_v28  ;;  %v400_v35 = vadd.f32 %v399_v33, %v287_v25  ;;  %v489_v36 = vadd.f32 %v488_v34, %v287_v25  ;;  %650 = vmatprep.mubr.f32.mxu0 %v504_v27  ;;  %735 = vmatprep.mubr.f32.mxu1 %v506_v28 }
  0xf5   : > { %v553_v37 = vadd.f32 %v504_v27, %v1227_v23  ;;  %v1240_v38 = vmax.f32 %v398_v31, 0.0  ;;  %v1242_v39 = vmax.f32 %v487_v32, 0.0  ;;  %v552_v32 = vld [vmem:[%s1212_s12 + $0x18] sm:$0xff] }
  0xf6   : > { %v1244_v40 = vmax.f32 %v400_v35, 0.0  ;;  %v1246_v41 = vmax.f32 %v489_v36, 0.0  ;;  %v403_v42 = vpop.f32.mrb[4].mxu0  ;;  %v492_v43 = vpop.f32.mrb[4].mxu1  ;;  %v582_v35 = vld [vmem:[%s1286_s17] sm:$0xff] }
  0xf7   : > { %v554_v44 = vadd.f32 %v553_v37, %v1229_v24  ;;  %523 = vst [vmem:[%s1231_s18 + $0x20] sm:$0xff] %v1240_v38  ;;  %525 = vst [vmem:[%s1231_s18 + $0x30] sm:$0xff] %v1242_v39  ;;  %v404_v45 = vadd.f32 %v403_v42, %v292_v26  ;;  %v493_v46 = vadd.f32 %v492_v43, %v292_v26  ;;  %v405_v47 = vpop.f32.mrb[5].mxu0  ;;  %v494_v48 = vpop.f32.mrb[5].mxu1  ;;  %v583_v42 = vld [vmem:[%s1286_s17 + $0x8] sm:$0xff] }
  0xf8   : > { %v983_v49 = vpack.c.bf16 %v1240_v38, %v1227_v23  ;;  %v991_v50 = vpack.c.bf16 %v1242_v39, %v1229_v24  ;;  %524 = vst [vmem:[%s1231_s18 + $0x28] sm:$0xff] %v1244_v40  ;;  %526 = vst [vmem:[%s1231_s18 + $0x38] sm:$0xff] %v1246_v41  ;;  %v406_v51 = vadd.f32 %v405_v47, %v292_v26 }
  0xf9   : > { %v495_v52 = vadd.f32 %v494_v48, %v292_v26  ;;  %v981_v53 = vpack.c.bf16 %v1244_v40, %v504_v27  ;;  %v989_v54 = vpack.c.bf16 %v1246_v41, %v506_v28  ;;  %v511_v55 = vmax.f32 %v404_v45, 0.0  ;;  %v550_v26 = vld [vmem:[%s1212_s12 + $0x8] sm:$0xff] }
  0xfa   : > { %v513_v56 = vmax.f32 %v493_v46, 0.0  ;;  %v555_v58 = vadd.f32 %v554_v44, %v506_v28  ;;  %v558_v59 = vadd.f32 %v1244_v40, %v1240_v38  ;;  %v512_v60 = vmax.f32 %v406_v51, 0.0  ;;  %v409_v62 = vpop.f32.mrb[6].mxu0  ;;  %v498_v63 = vpop.f32.mrb[6].mxu1 }
  0xfb   : > { %v514_v61 = vmax.f32 %v495_v52, 0.0  ;;  %982 = vmatprep.subr.bf16.mxu0 %v981_v53  ;;  %990 = vmatprep.subr.bf16.mxu1 %v989_v54  ;;  %527 = vst [vmem:[%s1231_s18 + $0x40] sm:$0xff] %v511_v55  ;;  %v410_v1 = vadd.f32 %v409_v62, %v297_v57  ;;  %v499_v2 = vadd.f32 %v498_v63, %v297_v57  ;;  %v411_v3 = vpop.f32.mrb[7].mxu0  ;;  %v500_v4 = vpop.f32.mrb[7].mxu1  ;;  %v798_v62 = vld [vmem:[%s1231_s18] sm:$0xff] (%p1147_p3)  ;;  %v800_v63 = vld [vmem:[%s1231_s18 + $0x8] sm:$0xff] (%p1147_p3) }
  0xfc   : > { %529 = vst [vmem:[%s1231_s18 + $0x50] sm:$0xff] %v513_v56  ;;  %556 = vadd.xlane.f32.xlu0 %v555_v58  ;;  %984 = vmatpush1.bf16.xpose.msra.mxu0 %v983_v49  ;;  %v559_v5 = vadd.f32 %v558_v59, %v1242_v39  ;;  %528 = vst [vmem:[%s1231_s18 + $0x48] sm:$0xff] %v512_v60  ;;  %v412_v6 = vadd.f32 %v411_v3, %v297_v57  ;;  %v584_v49 = vld [vmem:[%s1286_s17 + $0x10] sm:$0xff] }
  0xfd   : > { %530 = vst [vmem:[%s1231_s18 + $0x58] sm:$0xff] %v514_v61  ;;  %v501_v7 = vadd.f32 %v500_v4, %v297_v57  ;;  %992 = vmatpush1.bf16.xpose.msra.mxu1 %v991_v50  ;;  %v563_v8 = vadd.f32 %v512_v60, %v511_v55  ;;  %v515_v9 = vmax.f32 %v410_v1, 0.0  ;;  %v517_v10 = vmax.f32 %v499_v2, 0.0  ;;  %v802_v1 = vld [vmem:[%s1231_s18 + $0x10] sm:$0xff] (%p1147_p3)  ;;  %v804_v2 = vld [vmem:[%s1231_s18 + $0x18] sm:$0xff] (%p1147_p3)  ;;  %799 = vst [vmem:[%s785_s29] sm:$0xff] (%p1147_p3), %v798_v62 }
  0xfe   : > { %v560_v11 = vadd.f32 %v559_v5, %v1246_v41  ;;  %v516_v12 = vmax.f32 %v412_v6, 0.0  ;;  %v806_v3 = vld [vmem:[%s1231_s18 + $0x20] sm:$0xff] (%p1147_p3)  ;;  %801 = vst [vmem:[%s785_s29 + $0x8] sm:$0xff] (%p1147_p3), %v800_v63  ;;  %803 = vst [vmem:[%s785_s29 + $0x10] sm:$0xff] (%p1147_p3), %v802_v1  ;;  %v810_v5 = vld [vmem:[%s1231_s18 + $0x30] sm:$0xff] (%p1147_p3) }
  0xff   : > { %v518_v13 = vmax.f32 %v501_v7, 0.0  ;;  %v564_v14 = vadd.f32 %v563_v8, %v513_v56  ;;  %531 = vst [vmem:[%s1231_s18 + $0x60] sm:$0xff] %v515_v9  ;;  %533 = vst [vmem:[%s1231_s18 + $0x70] sm:$0xff] %v517_v10  ;;  %v987_v15 = vpack.c.bf16 %v515_v9, %v511_v55  ;;  %v995_v16 = vpack.c.bf16 %v517_v10, %v513_v56  ;;  %v808_v4 = vld [vmem:[%s1231_s18 + $0x28] sm:$0xff] (%p1147_p3)  ;;  %v812_v6 = vld [vmem:[%s1231_s18 + $0x38] sm:$0xff] (%p1147_p3) }
 0x100   : > { %561 = vadd.xlane.f32.xlu1 %v560_v11  ;;  %532 = vst [vmem:[%s1231_s18 + $0x68] sm:$0xff] %v516_v12  ;;  %v985_v17 = vpack.c.bf16 %v516_v12, %v512_v60  ;;  %v568_v20 = vadd.f32 %v516_v12, %v515_v9  ;;  %805 = vst [vmem:[%s785_s29 + $0x18] sm:$0xff] (%p1147_p3), %v804_v2 }
 0x101   : > { %534 = vst [vmem:[%s1231_s18 + $0x78] sm:$0xff] %v518_v13  ;;  %v993_v18 = vpack.c.bf16 %v518_v13, %v514_v61  ;;  %v565_v19 = vadd.f32 %v564_v14, %v514_v61  ;;  %807 = vst [vmem:[%s785_s29 + $0x40] sm:$0xff] (%p1147_p3), %v806_v3 }
 0x102   : > { %986 = vmatprep.subr.bf16.mxu0 %v985_v17  ;;  %v569_v21 = vadd.f32 %v568_v20, %v517_v10  ;;  %809 = vst [vmem:[%s785_s29 + $0x48] sm:$0xff] (%p1147_p3), %v808_v4  ;;  %v814_v7 = vld [vmem:[%s1231_s18 + $0x40] sm:$0xff] (%p1147_p3)  ;;  %811 = vst [vmem:[%s785_s29 + $0x50] sm:$0xff] (%p1147_p3), %v810_v5 }
 0x103   : > { %994 = vmatprep.subr.bf16.mxu1 %v993_v18  ;;  %566 = vadd.xlane.f32.xlu0 %v565_v19  ;;  %813 = vst [vmem:[%s785_s29 + $0x58] sm:$0xff] (%p1147_p3), %v812_v6  ;;  %815 = vst [vmem:[%s785_s29 + $0x80] sm:$0xff] (%p1147_p3), %v814_v7  ;;  %v816_v8 = vld [vmem:[%s1231_s18 + $0x48] sm:$0xff] (%p1147_p3) }
 0x104   : > { %988 = vmatpush1.bf16.xpose.msra.mxu0 %v987_v15  ;;  %v570_v22 = vadd.f32 %v569_v21, %v518_v13  ;;  %817 = vst [vmem:[%s785_s29 + $0x88] sm:$0xff] (%p1147_p3), %v816_v8 }
 0x105   : > { %996 = vmatpush1.bf16.xpose.msra.mxu1 %v995_v16 }
 0x106   : > { %v822_v11 = vld [vmem:[%s1231_s18 + $0x60] sm:$0xff] (%p1147_p3) }
 0x107   : > { %571 = vadd.xlane.f32.xlu0 %v570_v22  ;;  %823 = vst [vmem:[%s785_s29 + $0xc0] sm:$0xff] (%p1147_p3), %v822_v11 }
 0x108   : > { %v828_v14 = vld [vmem:[%s1231_s18 + $0x78] sm:$0xff] (%p1147_p3) }
 0x109   : > { %829 = vst [vmem:[%s785_s29 + $0xd8] sm:$0xff] (%p1147_p3), %v828_v14 }
 0x10b   : > { %651 = vmatmul.mubr.f32.vlgmr.msra.gmra.mrb[8].mxu0 %v1227_v23  ;;  %v549_v23 = vld [vmem:[%s1212_s12] sm:$0xff] }
 0x10c   : > { %736 = vmatmul.mubr.f32.vlgmr.msra.gmra.mrb[8].mxu1 %v1229_v24  ;;  %655 = vmatprep.mubr.f32.mxu0 %v1244_v40 }
 0x10d   : > { %740 = vmatprep.mubr.f32.mxu1 %v1246_v41 }
 0x10f   : > { %656 = vmatmul.mubr.f32.gmra.mrb[10].mxu0 %v1240_v38 }
 0x110   : > { %741 = vmatmul.mubr.f32.gmra.mrb[10].mxu1 %v1242_v39  ;;  %660 = vmatprep.mubr.f32.mxu0 %v512_v60 }
 0x111   : > { %745 = vmatprep.mubr.f32.mxu1 %v514_v61 }
 0x113   : > { %661 = vmatmul.mubr.f32.gmra.mrb[12].mxu0 %v511_v55 }
 0x114   : > { %746 = vmatmul.mubr.f32.gmra.mrb[12].mxu1 %v513_v56  ;;  %665 = vmatprep.mubr.f32.mxu0 %v516_v12  ;;  %v585_v56 = vld [vmem:[%s1286_s17 + $0x18] sm:$0xff]  ;;  %v824_v12 = vld [vmem:[%s1231_s18 + $0x68] sm:$0xff] (%p1147_p3) }
 0x115   : > { %750 = vmatprep.mubr.f32.mxu1 %v518_v13  ;;  %v826_v13 = vld [vmem:[%s1231_s18 + $0x70] sm:$0xff] (%p1147_p3)  ;;  %825 = vst [vmem:[%s785_s29 + $0xc8] sm:$0xff] (%p1147_p3), %v824_v12 }
 0x116   : > { %827 = vst [vmem:[%s785_s29 + $0xd0] sm:$0xff] (%p1147_p3), %v826_v13 }
 0x117   : > { %666 = vmatmul.mubr.f32.gmra.mrb[14].mxu0 %v515_v9  ;;  %v818_v9 = vld [vmem:[%s1231_s18 + $0x50] sm:$0xff] (%p1147_p3) }
 0x118   : > { %751 = vmatmul.mubr.f32.gmra.mrb[14].mxu1 %v517_v10  ;;  %v820_v10 = vld [vmem:[%s1231_s18 + $0x58] sm:$0xff] (%p1147_p3)  ;;  %819 = vst [vmem:[%s785_s29 + $0x90] sm:$0xff] (%p1147_p3), %v818_v9 }
 0x119   : > { %821 = vst [vmem:[%s785_s29 + $0x98] sm:$0xff] (%p1147_p3), %v820_v10 }
 0x189   : > { %v557_v24 = vpop.xlane.xlu0 %556 }
 0x18a   : > { %v573_v25 = vadd.f32 %v557_v24, %v549_v23 }
 0x18c   : > { %578 = vst.msk [vmem:[%s1212_s12] sm:$0xff] %vm539_vm2, %v573_v25 }
 0x18d   : > { %v562_v27 = vpop.xlane.xlu1 %561 }
 0x18e   : > { %v574_v28 = vadd.f32 %v562_v27, %v550_v26 }
 0x190   : > { %579 = vst.msk [vmem:[%s1212_s12 + $0x8] sm:$0xff] %vm539_vm2, %v574_v28  ;;  %v567_v30 = vpop.xlane.xlu0 %566 }
 0x191   : > { %v575_v31 = vadd.f32 %v567_v30, %v551_v29 }
 0x193   : > { %580 = vst.msk [vmem:[%s1212_s12 + $0x10] sm:$0xff] %vm539_vm2, %v575_v31 }
 0x194   : > { %v572_v0 = vpop.xlane.xlu0 %571 }
 0x195   : > { %v576_v33 = vadd.f32 %v572_v0, %v552_v32 }
 0x197   : > { %581 = vst.msk [vmem:[%s1212_s12 + $0x18] sm:$0xff] %vm539_vm2, %v576_v33 }
 0x1de   : > { %v652_v34 = vpop.f32.mrb[8].mxu0 }
 0x1df   : > { %v737_v36 = vpop.f32.mrb[8].mxu1  ;;  %v654_v37 = vpop.f32.mrb[9].mxu0 }
 0x1e0   : > { %v738_v38 = vadd.f32 %v737_v36, %v652_v34  ;;  %v739_v39 = vpop.f32.mrb[9].mxu1 }
 0x1e2   : > { %v756_v40 = vadd.f32 %v738_v38, %v582_v35  ;;  %v657_v41 = vpop.f32.mrb[10].mxu0 }
 0x1e3   : > { %v742_v43 = vpop.f32.mrb[10].mxu1  ;;  %v659_v44 = vpop.f32.mrb[11].mxu0 }
 0x1e4   : > { %761 = vst.msk [vmem:[%s1286_s17] sm:$0xff] %vm544_vm3, %v756_v40  ;;  %v743_v45 = vadd.f32 %v742_v43, %v657_v41  ;;  %v744_v46 = vpop.f32.mrb[11].mxu1 }
 0x1e6   : > { %v757_v47 = vadd.f32 %v743_v45, %v583_v42  ;;  %v662_v48 = vpop.f32.mrb[12].mxu0 }
 0x1e7   : > { %v747_v50 = vpop.f32.mrb[12].mxu1  ;;  %v664_v51 = vpop.f32.mrb[13].mxu0 }
 0x1e8   : > { %762 = vst.msk [vmem:[%s1286_s17 + $0x8] sm:$0xff] %vm544_vm3, %v757_v47  ;;  %v748_v52 = vadd.f32 %v747_v50, %v662_v48  ;;  %v749_v53 = vpop.f32.mrb[13].mxu1 }
 0x1ea   : > { %v758_v54 = vadd.f32 %v748_v52, %v584_v49  ;;  %v667_v55 = vpop.f32.mrb[14].mxu0  ;;  %781 = sbr.rel (!%p1147_p3) target bundleno = 497 (0x1f1), region = 40 }
 0x1eb   : > { %v752_v57 = vpop.f32.mrb[14].mxu1  ;;  %v669_v58 = vpop.f32.mrb[15].mxu0 }
 0x1ec   : > { %763 = vst.msk [vmem:[%s1286_s17 + $0x10] sm:$0xff] %vm544_vm3, %v758_v54  ;;  %v753_v59 = vadd.f32 %v752_v57, %v667_v55  ;;  %v754_v60 = vpop.f32.mrb[15].mxu1 }
 0x1ee   : > { %v759_v61 = vadd.f32 %v753_v59, %v585_v56 }
 0x1f0   : > { %764 = vst.msk [vmem:[%s1286_s17 + $0x18] sm:$0xff] %vm544_vm3, %v759_v61 }
 0x1f1 PF: > { %s16_s22 = sadd.s32 1, %s1081_s22   ;;  %s1368_s18 = smov %s1069_s19 }
 0x1f2   : > { %p13_p10 = scmp.ge.s32.totalorder %s16_s22, 4   ;;  %s1369_s19 = smov %s1156_s28 }
 0x1f3   : > { %s1370_s20 = smov %s1077_s21  ;;  %s1371_s21 = smov %s1373_s24 }
 0x1f4   :  { %15 = sbr.rel (!%p13_p10) target bundleno = 3 (0x3), region = 113 }

// kernel: _forward_impl.5
= control target key start
LH: loop header
LB: loop body
LE: loop exit
PB: predicated region body
PF: predicated region fallthrough
CT: control target
= control target key end

     0   :  { %s631_s12 = smov 0   ;;  %s633_s13 = smov 0   ;;  %s743_s0 = inlined_call_operand.vmem [shape: f32[32,1024], index: 0, kind: input, shape index: {}]   ;;  %s744_s1 = inlined_call_operand.vmem [shape: f32[16,32], index: 1, kind: input, shape index: {}]   ;;  %s745_s2 = inlined_call_operand.vmem [shape: f32[16,1], index: 2, kind: input, shape index: {}]   ;;  %s746_s3 = inlined_call_operand.vmem [shape: f32[16,1024], index: 3, kind: output, shape index: {}]  }
   0x1   :  { %s635_s14 = smov 0  }
   0x2 LB: > { %s521_s15 = sadd.s32 4294967295, %s607_s14   ;;  %s648_s16 = sadd.s32 1, %s607_s14   ;;  %s607_s14 = sphi %s635_s14, %s750_s14   ;;  %s603_s13 = sphi %s633_s13, %s749_s13   ;;  %s599_s12 = sphi %s631_s12, %s748_s12  }
   0x3   : > { %s17_s17 = ssub.s32 %s607_s14, %s648_s16  ;;  %s20_s18 = sadd.s32 1, %s603_s13 }
   0x4   : > { %p18_p0 = scmp.eq.s32.totalorder %s17_s17, 0  ;;  %p27_p1 = scmp.ne.s32.totalorder %s603_s13, %s599_s12 }
   0x5   : > { %p28_p2 = scmp.eq.s32.totalorder %s607_s14, 0  ;;  %p99_p3 = scmp.eq.s32.totalorder %s521_s15, 1 }
   0x6   : > { %s659_s19 = scalar_select %p18_p0, %s603_s13, %s20_s18  }
   0x7   : > { %p29_p4 = por %p28_p2, %p27_p1  ;;  %p661_p5 = por %p99_p3, %p27_p1 }
   0x8   : > { %p524_p6 = scmp.ge.s32.totalorder %s607_s14, 2 }
   0xa   : > { %127 = sbr.rel (%p524_p6) target bundleno = 29 (0x1d), region = 24 }
  0x11   : > { %130 = sbr.rel (!%p29_p4) target bundleno = 29 (0x1d), region = 28  ;;  %s132_s21 = sand.u32 (%p29_p4), 1, %s603_s13  }
  0x12   : > { %s540_s22 = sshll.u32 (%p29_p4), %s607_s14, 5  ;;  %s525_s23 = sshll.u32 (%p29_p4), %s132_s21, 7 }
  0x13   : > { %s671_s26 = scalar_lea.vmem (%p29_p4), %s743_s0, %s540_s22  ;;  %s134_s27 = scalar_lea.vmem (%p29_p4), [#allocation2], %s525_s23 }
  0x14   : > { %v150_v0 = vld [vmem:[%s671_s26] sm:$0xff] (%p29_p4)  ;;  %v152_v1 = vld [vmem:[%s671_s26 + $0x8] sm:$0xff] (%p29_p4)  ;;  %v154_v2 = vld [vmem:[%s671_s26 + $0x10] sm:$0xff] (%p29_p4) }
  0x15   : > { %151 = vst [vmem:[%s134_s27] sm:$0xff] (%p29_p4), %v150_v0  ;;  %153 = vst [vmem:[%s134_s27 + $0x8] sm:$0xff] (%p29_p4), %v152_v1  ;;  %v156_v3 = vld [vmem:[%s671_s26 + $0x18] sm:$0xff] (%p29_p4)  ;;  %v158_v4 = vld [vmem:[%s671_s26 + $0x40] sm:$0xff] (%p29_p4) }
  0x16   : > { %155 = vst [vmem:[%s134_s27 + $0x10] sm:$0xff] (%p29_p4), %v154_v2  ;;  %v160_v5 = vld [vmem:[%s671_s26 + $0x48] sm:$0xff] (%p29_p4)  ;;  %157 = vst [vmem:[%s134_s27 + $0x18] sm:$0xff] (%p29_p4), %v156_v3  ;;  %v162_v6 = vld [vmem:[%s671_s26 + $0x50] sm:$0xff] (%p29_p4) }
  0x17   : > { %159 = vst [vmem:[%s134_s27 + $0x20] sm:$0xff] (%p29_p4), %v158_v4  ;;  %161 = vst [vmem:[%s134_s27 + $0x28] sm:$0xff] (%p29_p4), %v160_v5  ;;  %v164_v7 = vld [vmem:[%s671_s26 + $0x58] sm:$0xff] (%p29_p4)  ;;  %v166_v8 = vld [vmem:[%s671_s26 + $0x80] sm:$0xff] (%p29_p4) }
  0x18   : > { %163 = vst [vmem:[%s134_s27 + $0x30] sm:$0xff] %v162_v6  ;;  %165 = vst [vmem:[%s134_s27 + $0x38] sm:$0xff] %v164_v7  ;;  %v168_v9 = vld [vmem:[%s671_s26 + $0x88] sm:$0xff]  ;;  %v170_v10 = vld [vmem:[%s671_s26 + $0x90] sm:$0xff] }
  0x19   : > { %167 = vst [vmem:[%s134_s27 + $0x40] sm:$0xff] %v166_v8  ;;  %v172_v11 = vld [vmem:[%s671_s26 + $0x98] sm:$0xff]  ;;  %169 = vst [vmem:[%s134_s27 + $0x48] sm:$0xff] %v168_v9  ;;  %v174_v12 = vld [vmem:[%s671_s26 + $0xc0] sm:$0xff] }
  0x1a   : > { %171 = vst [vmem:[%s134_s27 + $0x50] sm:$0xff] %v170_v10  ;;  %173 = vst [vmem:[%s134_s27 + $0x58] sm:$0xff] %v172_v11  ;;  %v176_v13 = vld [vmem:[%s671_s26 + $0xc8] sm:$0xff]  ;;  %v178_v14 = vld [vmem:[%s671_s26 + $0xd0] sm:$0xff] }
  0x1b   : > { %175 = vst [vmem:[%s134_s27 + $0x60] sm:$0xff] %v174_v12  ;;  %177 = vst [vmem:[%s134_s27 + $0x68] sm:$0xff] %v176_v13  ;;  %v180_v15 = vld [vmem:[%s671_s26 + $0xd8] sm:$0xff] }
  0x1c   : > { %179 = vst [vmem:[%s134_s27 + $0x70] sm:$0xff] %v178_v14  ;;  %181 = vst [vmem:[%s134_s27 + $0x78] sm:$0xff] %v180_v15 }
  0x1d PF: > { %p528_p7 = scmp.ge.s32.totalorder %s607_s14, 1  ;;  %p186_p8 = scmp.lt.s32.totalorder %s607_s14, 3 }
  0x1f   : > { %p187_p9 = pnand %p528_p7, %p186_p8 }
  0x20   : > { %s193_s28 = sand.u32 (!%p187_p9), 1, %s599_s12   ;;  %v609_v16 = vmov (!%p187_p9), 0.0   ;;  %v235_v17 = vld [vmem:[%s745_s2] sm:$0xff] (!%p187_p9)  ;;  %v610_v18 = vmov (!%p187_p9), 0   ;;  %v236_v22 = vld [vmem:[%s745_s2 + $0x8] sm:$0xff] (!%p187_p9)  ;;  %vm247_vm0 = vcmask (!%p187_p9), 261120  }
  0x21   : > { %190 = sbr.rel (%p187_p9) target bundleno = 278 (0x116), region = 51  ;;  %s529_s29 = sshll.u32 (!%p187_p9), %s193_s28, 7  ;;  %318 = vmatprep.mubr.f32.mxu0 (!%p187_p9), %v609_v16  ;;  %395 = vmatprep.mubr.f32.mxu1 (!%p187_p9), %v609_v16  ;;  %v217_v44 = vld [vmem:[%s744_s1] sm:$0xff] (!%p187_p9)  ;;  %v218_v45 = vld [vmem:[%s744_s1 + $0x8] sm:$0xff] (!%p187_p9) }
  0x22   : > { %584 = vset.pattern.permute.xlu0 (!%p187_p9), %v610_v18  ;;  %s195_s5 = scalar_lea.vmem (!%p187_p9), [#allocation2], %s529_s29  ;;  %s530_s17 = sshll.u32 (!%p187_p9), %s193_s28, 6 }
  0x23   : > { %v220_v19 = vld [vmem:[%s195_s5 + $0x8] sm:$0xff] (!%p187_p9)  ;;  %v222_v21 = vld [vmem:[%s195_s5 + $0x18] sm:$0xff] (!%p187_p9)  ;;  %239 = vperm.xlu0 (!%p187_p9), %584, %v235_v17   ;;  %v219_v25 = vld [vmem:[%s195_s5] sm:$0xff] (!%p187_p9)  ;;  %s708_s18 = scalar_lea.vmem (!%p187_p9), [#allocation3], %s530_s17 }
  0x24   : > { %v224_v20 = vld [vmem:[%s195_s5 + $0x28] sm:$0xff] (!%p187_p9)  ;;  %v226_v24 = vld [vmem:[%s195_s5 + $0x38] sm:$0xff] (!%p187_p9)  ;;  %v223_v26 = vld [vmem:[%s195_s5 + $0x20] sm:$0xff] (!%p187_p9) }
  0x25   : > { %v542_v23 = vpack.c.bf16 (!%p187_p9), %v224_v20, %v220_v19  ;;  %v550_v27 = vpack.c.bf16 (!%p187_p9), %v226_v24, %v222_v21  ;;  %v544_v28 = vpack.c.bf16 (!%p187_p9), %v223_v26, %v219_v25  ;;  %v221_v29 = vld [vmem:[%s195_s5 + $0x10] sm:$0xff] (!%p187_p9)  ;;  %v228_v31 = vld [vmem:[%s195_s5 + $0x48] sm:$0xff] (!%p187_p9)  ;;  %v230_v34 = vld [vmem:[%s195_s5 + $0x58] sm:$0xff] (!%p187_p9) }
  0x26   : > { %v225_v30 = vld [vmem:[%s195_s5 + $0x30] sm:$0xff] (!%p187_p9)  ;;  %v232_v33 = vld [vmem:[%s195_s5 + $0x68] sm:$0xff] (!%p187_p9)  ;;  %v234_v35 = vld [vmem:[%s195_s5 + $0x78] sm:$0xff] (!%p187_p9) }
  0x27   : > { %543 = vmatprep.subr.bf16.mxu0 (!%p187_p9), %v542_v23  ;;  %v552_v32 = vpack.c.bf16 (!%p187_p9), %v225_v30, %v221_v29  ;;  %551 = vmatprep.subr.bf16.mxu1 (!%p187_p9), %v550_v27  ;;  %v546_v36 = vpack.c.bf16 (!%p187_p9), %v232_v33, %v228_v31  ;;  %v554_v37 = vpack.c.bf16 (!%p187_p9), %v234_v35, %v230_v34  ;;  %v227_v38 = vld [vmem:[%s195_s5 + $0x40] sm:$0xff] (!%p187_p9)  ;;  %v229_v40 = vld [vmem:[%s195_s5 + $0x50] sm:$0xff] (!%p187_p9) }
  0x28   : > { %545 = vmatpush1.bf16.msra.mxu0 %v544_v28  ;;  %v231_v39 = vld [vmem:[%s195_s5 + $0x60] sm:$0xff]  ;;  %v233_v42 = vld [vmem:[%s195_s5 + $0x70] sm:$0xff]  ;;  %244 = vperm.xlu0 %584, %v236_v22   ;;  %s541_s12 = sshll.u32 (%p661_p5), %s521_s15, 5 }
  0x29   : > { %553 = vmatpush1.bf16.msra.mxu1 %v552_v32  ;;  %v548_v41 = vpack.c.bf16 %v231_v39, %v227_v38  ;;  %547 = vmatprep.subr.bf16.mxu0 %v546_v36  ;;  %v556_v43 = vpack.c.bf16 %v233_v42, %v229_v40  ;;  %s433_s23 = scalar_lea.vmem (%p661_p5), %s746_s3, %s541_s12 }
  0x2a   : > { %555 = vmatprep.subr.bf16.mxu1 %v554_v37 }
  0x2c   : > { %549 = vmatpush1.bf16.msra.mxu0 %v548_v41 }
  0x2d   : > { %557 = vmatpush1.bf16.msra.mxu1 %v556_v43 }
  0x2f   : > { %531 = vmatmul.mubr.msk.f32.vlgmr.msra.gmra.mrb[0].mxu0 %vm247_vm0, %v217_v44 }
  0x30   : > { %533 = vmatmul.mubr.msk.f32.vlgmr.msra.gmra.mrb[0].mxu1 %vm247_vm0, %v217_v44  ;;  %324 = vmatprep.mubr.f32.mxu0 %v609_v16 }
  0x31   : > { %401 = vmatprep.mubr.f32.mxu1 %v609_v16 }
  0x33   : > { %532 = vmatmul.mubr.msk.f32.gmra.mrb[2].mxu0 %vm247_vm0, %v218_v45 }
  0x34   : > { %534 = vmatmul.mubr.msk.f32.gmra.mrb[2].mxu1 %vm247_vm0, %v218_v45 }
  0xa2   : > { %v240_v46 = vpop.permute.xlu0 %239 }
  0xa7   : > { %v245_v57 = vpop.permute.xlu0 %244 }
 0x102   : > { %v320_v47 = vpop.f32.mrb[0].mxu0 }
 0x103   : > { %v321_v48 = vadd.f32 %v320_v47, %v240_v46  ;;  %v397_v49 = vpop.f32.mrb[0].mxu1  ;;  %v322_v50 = vpop.f32.mrb[1].mxu0 }
 0x104   : > { %v398_v51 = vadd.f32 %v397_v49, %v240_v46  ;;  %v323_v52 = vadd.f32 %v322_v50, %v240_v46  ;;  %v399_v53 = vpop.f32.mrb[1].mxu1 }
 0x105   : > { %v408_v54 = vmax.f32 %v321_v48, 0.0  ;;  %v400_v55 = vadd.f32 %v399_v53, %v240_v46 }
 0x106   : > { %v410_v56 = vmax.f32 %v398_v51, 0.0  ;;  %v409_v58 = vmax.f32 %v323_v52, 0.0  ;;  %v326_v59 = vpop.f32.mrb[2].mxu0 }
 0x107   : > { %416 = vst [vmem:[%s708_s18] sm:$0xff] %v408_v54  ;;  %v411_v60 = vmax.f32 %v400_v55, 0.0  ;;  %v327_v61 = vadd.f32 %v326_v59, %v245_v57  ;;  %v403_v62 = vpop.f32.mrb[2].mxu1  ;;  %v328_v63 = vpop.f32.mrb[3].mxu0  ;;  %430 = sbr.rel (!%p661_p5) target bundleno = 278 (0x116), region = 59 }
 0x108   : > { %418 = vst [vmem:[%s708_s18 + $0x10] sm:$0xff] %v410_v56  ;;  %417 = vst [vmem:[%s708_s18 + $0x8] sm:$0xff] %v409_v58  ;;  %v404_v0 = vadd.f32 %v403_v62, %v245_v57  ;;  %v329_v1 = vadd.f32 %v328_v63, %v245_v57  ;;  %v405_v2 = vpop.f32.mrb[3].mxu1 }
 0x109   : > { %419 = vst [vmem:[%s708_s18 + $0x18] sm:$0xff] %v411_v60  ;;  %v412_v3 = vmax.f32 %v327_v61, 0.0  ;;  %v406_v4 = vadd.f32 %v405_v2, %v245_v57 }
 0x10a   : > { %v414_v5 = vmax.f32 %v404_v0, 0.0  ;;  %v413_v6 = vmax.f32 %v329_v1, 0.0 }
 0x10b   : > { %420 = vst [vmem:[%s708_s18 + $0x20] sm:$0xff] %v412_v3  ;;  %v415_v7 = vmax.f32 %v406_v4, 0.0 }
 0x10c   : > { %422 = vst [vmem:[%s708_s18 + $0x30] sm:$0xff] %v414_v5  ;;  %421 = vst [vmem:[%s708_s18 + $0x28] sm:$0xff] %v413_v6 }
 0x10d   : > { %423 = vst [vmem:[%s708_s18 + $0x38] sm:$0xff] %v415_v7 }
 0x10e   : > { %v446_v8 = vld [vmem:[%s708_s18] sm:$0xff] }
 0x10f   : > { %v448_v9 = vld [vmem:[%s708_s18 + $0x8] sm:$0xff]  ;;  %v450_v10 = vld [vmem:[%s708_s18 + $0x10] sm:$0xff]  ;;  %447 = vst [vmem:[%s433_s23] sm:$0xff] %v446_v8 }
 0x110   : > { %v452_v11 = vld [vmem:[%s708_s18 + $0x18] sm:$0xff]  ;;  %449 = vst [vmem:[%s433_s23 + $0x8] sm:$0xff] %v448_v9  ;;  %451 = vst [vmem:[%s433_s23 + $0x10] sm:$0xff] %v450_v10 }
 0x111   : > { %453 = vst [vmem:[%s433_s23 + $0x18] sm:$0xff] %v452_v11 }
 0x112   : > { %v454_v12 = vld [vmem:[%s708_s18 + $0x20] sm:$0xff] }
 0x113   : > { %v456_v13 = vld [vmem:[%s708_s18 + $0x28] sm:$0xff]  ;;  %455 = vst [vmem:[%s433_s23 + $0x40] sm:$0xff] %v454_v12  ;;  %v458_v14 = vld [vmem:[%s708_s18 + $0x30] sm:$0xff] }
 0x114   : > { %457 = vst [vmem:[%s433_s23 + $0x48] sm:$0xff] %v456_v13  ;;  %v460_v15 = vld [vmem:[%s708_s18 + $0x38] sm:$0xff]  ;;  %459 = vst [vmem:[%s433_s23 + $0x50] sm:$0xff] %v458_v14 }
 0x115   : > { %461 = vst [vmem:[%s433_s23 + $0x58] sm:$0xff] %v460_v15 }
 0x116 PF: > { %p10_p10 = scmp.ge.s32.totalorder %s648_s16, 4   ;;  %s748_s12 = smov %s603_s13 }
 0x117   : > { %s749_s13 = smov %s659_s19  ;;  %s750_s14 = smov %s648_s16 }
 0x118   :  { %12 = sbr.rel (!%p10_p10) target bundleno = 2 (0x2), region = 113 }

</bundles_post_ra>
